<compile_context>
chip_gen: v5e
topology: v5e:2x2
jax: 0.10.0
libtpu: 0.0.40
codegen_flags: <defaults>
</compile_context>

<pallas_src>
import math

import jax
import jax.numpy as jnp
from jax.experimental import pallas as pl
from jax.experimental.pallas import tpu as pltpu


def _round_up(x, m):
    return (x + m - 1) // m * m


# ---------------------------------------------------------------------------
# Fused kernel: whole MultiLayerHGNN stack, grid = (num_layers, num_row_tiles).
#   x_ref   : [Np, FP]      node features (resident; read once at (0,0))
#   g_ref   : [TM, Np]      current row tile of the propagation matrix G
#   w_ref   : [1, FP, FP]   current layer's folded W'
#   ws_ref  : [1, FP, FP]   current layer's folded Wself'
#   b_ref   : [1, 1, FP]    current layer's folded bias/BN shift (f32)
#   o_ref   : [1, TM, FP]   per-layer activations (layer L-1 slab is the result)
#   act_ref : [Np, FP]      VMEM scratch: activations a_l, carried across the stack
#   sup_ref : [Np, FP]      VMEM scratch: support = a_l @ W'_l for the current layer
# ---------------------------------------------------------------------------
def fused_hgnn_kernel(x_ref, g_ref, w_ref, ws_ref, b_ref, o_ref, act_ref, sup_ref):
    l = pl.program_id(0)                      # layer index      (outer, "arbitrary")
    t = pl.program_id(1)                      # G row-tile index (inner, "arbitrary")
    tm = g_ref.shape[0]
    row0 = pl.multiple_of(t * tm, tm)

    # Layer-stack entry: load input features into the on-chip activation slab once;
    # intermediate activations never round-trip HBM afterwards.
    @pl.when(jnp.logical_and(l == 0, t == 0))
    def _():
        act_ref[...] = x_ref[...]

    # Once per layer: support = a_l @ W'_l over ALL rows (every G row-tile consumes
    # every row of support).  Overlaps with the first G row-tile's DMA.
    @pl.when(t == 0)
    def _():
        sup_ref[...] = jnp.dot(
            act_ref[...], w_ref[0], preferred_element_type=jnp.float32
        ).astype(sup_ref.dtype)

    # Per row tile: hypergraph propagation + self-loop + folded bias/BN, then ReLU.
    # Elementwise epilogue stays in f32 on every generation (v5e VPU has no bf16).
    a_tile = act_ref[pl.ds(row0, tm), :]                                    # a_l rows
    z = jnp.dot(g_ref[...], sup_ref[...], preferred_element_type=jnp.float32)
    z = z + jnp.dot(a_tile, ws_ref[0], preferred_element_type=jnp.float32)
    z = z + b_ref[0]
    y = jnp.maximum(z, 0.0)                   # ReLU; dropout is identity in eval mode

    act_ref[pl.ds(row0, tm), :] = y.astype(act_ref.dtype)                   # a_{l+1} rows
    o_ref[0] = y.astype(o_ref.dtype)


# ---------------------------------------------------------------------------
# Host-side parameter preparation: BN/bias folding + lane padding + stacking.
# ---------------------------------------------------------------------------
def fold_and_pack(layer_params, fp, eps=1e-5):
    w_l, ws_l, b_l = [], [], []
    for p in layer_params:
        scale = p["gamma"] / jnp.sqrt(p["var"] + eps)          # [1, F_out]
        w_f = p["w"] * scale                                   # fold BN scale into W
        wself_f = p["w_self"] * scale
        b_f = (p["b"] - p["mean"]) * scale + p["beta"]         # folded bias/BN shift
        fin, fout = p["w"].shape
        w_l.append(jnp.zeros((fp, fp), jnp.float32).at[:fin, :fout].set(w_f))
        ws_l.append(jnp.zeros((fp, fp), jnp.float32).at[:fin, :fout].set(wself_f))
        b_l.append(jnp.zeros((1, fp), jnp.float32).at[:, :fout].set(b_f))
    return jnp.stack(w_l), jnp.stack(ws_l), jnp.stack(b_l)     # [L,FP,FP] x2, [L,1,FP]


def multilayer_hgnn_forward(x, G, layer_params, *, use_bf16=True, tm_target=512, eps=1e-5):
    """MultiLayerHGNN.forward (aggrmethod='nores', dense=False, eval mode)."""
    n, f_in = x.shape
    out_f = layer_params[-1]["w"].shape[1]
    num_layers = len(layer_params)
    dims = [f_in] + [p["w"].shape[1] for p in layer_params]
    fp = _round_up(max(dims + [128]), 128)     # lane-dense feature slab (>= 128)

    # Row padding: 16 for bf16 (sublane packing), 8 for f32; TM a multiple of it.
    row_align = 16 if use_bf16 else 8
    n_al = _round_up(n, row_align)
    tm = max(row_align, (min(tm_target, n_al) // row_align) * row_align)
    n_pad = _round_up(n_al, tm)
    num_tiles = n_pad // tm

    w_stack, ws_stack, b_stack = fold_and_pack(layer_params, fp, eps)

    cdt = jnp.bfloat16 if use_bf16 else jnp.float32   # MXU operand dtype
    xp = jnp.zeros((n_pad, fp), jnp.float32).at[:n, :f_in].set(x).astype(cdt)
    Gp = jnp.zeros((n_pad, n_pad), jnp.float32).at[:n, :n].set(G).astype(cdt)
    w_stack = w_stack.astype(cdt)
    ws_stack = ws_stack.astype(cdt)
    # b_stack stays f32: the epilogue runs in f32 on every generation.

    isz = jnp.dtype(cdt).itemsize
    # VMEM budget: double-buffered I/O blocks + the two resident scratch slabs.
    resident = (2 * n_pad * fp * isz           # x block
                + 2 * tm * n_pad * isz         # G row tile (double-buffered)
                + 2 * 2 * fp * fp * isz        # W', Wself' layer slabs (double-buffered)
                + 2 * fp * 4                   # bias slab
                + 2 * tm * fp * 4              # output tile (double-buffered)
                + 2 * n_pad * fp * isz)        # act + support scratch
    # 64 MiB cap keeps the request valid on v7x; v5e/v6e have 128 MiB physical.
    vmem_limit = int(min(max(resident * 13 // 10 + (1 << 20), 32 << 20), 64 << 20))

    flops = num_layers * (4 * n_pad * fp * fp + 2 * n_pad * n_pad * fp)
    bytes_accessed = int(n_pad * fp * isz
                         + num_layers * n_pad * n_pad * isz          # G re-read per layer
                         + num_layers * (2 * fp * fp * isz + fp * 4)
                         + num_layers * n_pad * fp * 4)              # activation writebacks

    grid_spec = pltpu.PrefetchScalarGridSpec(
        num_scalar_prefetch=0,
        grid=(num_layers, num_tiles),
        in_specs=[
            pl.BlockSpec((n_pad, fp), lambda l, t: (0, 0)),       # x: fully resident
            pl.BlockSpec((tm, n_pad), lambda l, t: (t, 0)),       # G: row-tiled stream
            pl.BlockSpec((1, fp, fp), lambda l, t: (l, 0, 0)),    # W': per-layer stream
            pl.BlockSpec((1, fp, fp), lambda l, t: (l, 0, 0)),    # Wself': per-layer stream
            pl.BlockSpec((1, 1, fp), lambda l, t: (l, 0, 0)),     # b': per-layer stream
        ],
        out_specs=pl.BlockSpec((1, tm, fp), lambda l, t: (l, t, 0)),
        scratch_shapes=[
            pltpu.VMEM((n_pad, fp), cdt),     # activations a_l (carried across the stack)
            pltpu.VMEM((n_pad, fp), cdt),     # support = a_l @ W'_l (per layer)
        ],
    )

    out_all = pl.pallas_call(
        fused_hgnn_kernel,
        out_shape=jax.ShapeDtypeStruct((num_layers, n_pad, fp), jnp.float32),
        grid_spec=grid_spec,
        compiler_params=pltpu.CompilerParams(
            # Both axes carry VMEM scratch state (activations / support), so neither may
            # be sharded across TensorCores; see TODO(synk) for a megacore variant.
            dimension_semantics=("arbitrary", "arbitrary"),
            vmem_limit_bytes=vmem_limit,
        ),
        cost_estimate=pl.CostEstimate(flops=flops, transcendentals=0,
                                      bytes_accessed=bytes_accessed),
    )(xp, Gp, w_stack, ws_stack, b_stack)

    # aggrmethod='nores', dense=False: the result is the last layer's activations.
    return out_all[num_layers - 1, :n, :out_f]


# ---------------------------------------------------------------------------
# Parameter init (GCN-style uniform(-stdv, stdv)) + pure-JAX reference.
# ---------------------------------------------------------------------------
def init_layer_params(key, in_f, out_f):
    k1, k2, k3 = jax.random.split(key, 3)
    stdv = 1.0 / math.sqrt(out_f)
    return {
        "w":      jax.random.uniform(k1, (in_f, out_f), jnp.float32, -stdv, stdv),
        "w_self": jax.random.uniform(k2, (in_f, out_f), jnp.float32, -stdv, stdv),
        "b":      jax.random.uniform(k3, (1, out_f), jnp.float32, -stdv, stdv),
        "gamma":  jnp.ones((1, out_f), jnp.float32),
        "beta":   jnp.zeros((1, out_f), jnp.float32),
        "mean":   jnp.zeros((1, out_f), jnp.float32),
        "var":    jnp.ones((1, out_f), jnp.float32),
    }


def reference_forward(x, G, layer_params, eps=1e-5):
    """Pure-JAX reference of the unfused, unfolded layer stack (eval mode)."""
    hp = jax.lax.Precision.HIGHEST
    out = x
    for p in layer_params:
        support = jnp.dot(out, p["w"], precision=hp)
        z = (jnp.dot(G, support, precision=hp)
             + jnp.dot(out, p["w_self"], precision=hp) + p["b"])
        inv_std = 1.0 / jnp.sqrt(p["var"] + eps)
        z = (z - p["mean"]) * inv_std * p["gamma"] + p["beta"]
        out = jnp.maximum(z, 0.0)
    return out


if __name__ == "__main__":
    IN_FEATURES = 8    # in_features
    HIDDEN = 32        # hidden_features
    NBASELAYER = 2     # nbaselayer

    key = jax.random.PRNGKey(0)
    kparams, kin_small, kin_big = jax.random.split(key, 3)

    pkeys = jax.random.split(kparams, NBASELAYER)
    layer_params = []
    for i in range(NBASELAYER):
        fin = IN_FEATURES if i == 0 else HIDDEN
        layer_params.append(init_layer_params(pkeys[i], fin, HIDDEN))

    def make_inputs(k, n):
        kx, kg = jax.random.split(k)
        x = jax.random.normal(kx, (n, IN_FEATURES), jnp.float32)
        a = jax.random.uniform(kg, (n, n), jnp.float32)
        a = (a + a.T) * 0.5 + jnp.eye(n, dtype=jnp.float32)
        G = a / jnp.sum(a, axis=1, keepdims=True)   # dense row-normalized propagation
        return x, G

    # 1) f32 path, single row tile (G fully VMEM-resident) — tight semantics check.
    x, G = make_inputs(kin_small, 16)
    out = jax.block_until_ready(multilayer_hgnn_forward(x, G, layer_params, use_bf16=False))
    ref = reference_forward(x, G, layer_params)
    assert out.shape == (16, HIDDEN), out.shape
    assert bool(jnp.all(jnp.isfinite(out)))
    assert jnp.allclose(out, ref, atol=5e-3, rtol=5e-3), float(jnp.max(jnp.abs(out - ref)))

    # 2) f32 path, multi-row-tile grid — exercises G streaming, per-layer weight stream,
    #    the carried activation scratch and the padded-row invariant.
    x2, G2 = make_inputs(kin_big, 200)
    out2 = jax.block_until_ready(
        multilayer_hgnn_forward(x2, G2, layer_params, use_bf16=False, tm_target=64))
    ref2 = reference_forward(x2, G2, layer_params)
    assert out2.shape == (200, HIDDEN), out2.shape
    assert jnp.allclose(out2, ref2, atol=5e-3, rtol=5e-3), float(jnp.max(jnp.abs(out2 - ref2)))

    # 3) Default bf16-operand path (recommended on v5e/v6e/v7x), looser tolerance.
    out3 = jax.block_until_ready(
        multilayer_hgnn_forward(x2, G2, layer_params, tm_target=64))
    assert out3.shape == (200, HIDDEN), out3.shape
    assert bool(jnp.all(jnp.isfinite(out3)))
    assert jnp.allclose(out3, ref2, atol=5e-2, rtol=5e-2), float(jnp.max(jnp.abs(out3 - ref2)))

    print("KERNEL_OK")
</pallas_src>

<mosaic_0001>
module attributes {stable_mosaic.version = 11 : i64} {
  func.func @fused_hgnn_kernel(%arg0: i32, %arg1: i32, %arg2: memref<16x128xf32, #tpu.memory_space<vmem>>, %arg3: memref<16x16xf32, #tpu.memory_space<vmem>>, %arg4: memref<1x128x128xf32, #tpu.memory_space<vmem>>, %arg5: memref<1x128x128xf32, #tpu.memory_space<vmem>>, %arg6: memref<1x1x128xf32, #tpu.memory_space<vmem>>, %arg7: memref<1x16x128xf32, #tpu.memory_space<vmem>>, %arg8: memref<16x128xf32, #tpu.memory_space<vmem>>, %arg9: memref<16x128xf32, #tpu.memory_space<vmem>>) attributes {dimension_semantics = [#tpu.dimension_semantics<arbitrary>, #tpu.dimension_semantics<arbitrary>], iteration_bounds = array<i64: 2, 1>, scalar_prefetch = 0 : i64, scratch_operands = 2 : i64, tpu.core_type = #tpu.core_type<tc>, window_params = [{pipeline_mode = #tpu.pipeline_mode<synchronous>, transform_indices = @transform_0, window_bounds = array<i64: 16, 128>}, {transform_indices = @transform_1, window_bounds = array<i64: 16, 16>}, {transform_indices = @transform_2, window_bounds = array<i64: 1, 128, 128>}, {transform_indices = @transform_3, window_bounds = array<i64: 1, 128, 128>}, {transform_indices = @transform_4, window_bounds = array<i64: 1, 1, 128>}, {transform_indices = @transform_5, window_bounds = array<i64: 1, 16, 128>}]} {
    %c16_i32 = arith.constant 16 : i32
    %0 = arith.muli %arg1, %c16_i32 : i32
    %1 = tpu.assume_multiple %0, 16 : i32
    %c0_i32 = arith.constant 0 : i32
    %2 = arith.cmpi eq, %arg0, %c0_i32 : i32
    %c0_i32_0 = arith.constant 0 : i32
    %3 = arith.cmpi eq, %arg1, %c0_i32_0 : i32
    %4 = arith.andi %2, %3 : i1
    %5 = arith.extui %4 : i1 to i32
    %c0_i32_1 = arith.constant 0 : i32
    %6 = arith.cmpi ne, %5, %c0_i32_1 : i32
    scf.if %6 {
      %c0_20 = arith.constant 0 : index
      %c0_21 = arith.constant 0 : index
      %30 = vector.load %arg2[%c0_20, %c0_21] : memref<16x128xf32, #tpu.memory_space<vmem>>, vector<16x128xf32>
      %c0_22 = arith.constant 0 : index
      %c0_23 = arith.constant 0 : index
      %31 = vector.load %arg8[%c0_22, %c0_23] : memref<16x128xf32, #tpu.memory_space<vmem>>, vector<16x128xf32>
      tpu.vector_store %arg8[%c0_22, %c0_23], %30 {strides = array<i32>} : memref<16x128xf32, #tpu.memory_space<vmem>>, vector<16x128xf32>,
    } else {
    }
    %c0_i32_2 = arith.constant 0 : i32
    %7 = arith.cmpi eq, %arg1, %c0_i32_2 : i32
    %8 = arith.extui %7 : i1 to i32
    %c0_i32_3 = arith.constant 0 : i32
    %9 = arith.cmpi ne, %8, %c0_i32_3 : i32
    scf.if %9 {
      %c0_20 = arith.constant 0 : index
      %c0_21 = arith.constant 0 : index
      %30 = vector.load %arg8[%c0_20, %c0_21] : memref<16x128xf32, #tpu.memory_space<vmem>>, vector<16x128xf32>
      %c0_22 = arith.constant 0 : index
      %c0_23 = arith.constant 0 : index
      %c0_24 = arith.constant 0 : index
      %31 = vector.load %arg4[%c0_22, %c0_23, %c0_24] : memref<1x128x128xf32, #tpu.memory_space<vmem>>, vector<1x128x128xf32>
      %32 = vector.shape_cast %31 : vector<1x128x128xf32> to vector<128x128xf32>
      %cst_25 = arith.constant dense<0.000000e+00> : vector<16x128xf32>
      %33 = tpu.matmul %30, %32, %cst_25 {dimension_numbers = #tpu.dot_dimension_numbers<[1], [0], [0], [1], [0, 0, 1, 1], [], []>} : vector<16x128xf32>, vector<128x128xf32>, vector<16x128xf32> -> vector<16x128xf32>
      %c0_26 = arith.constant 0 : index
      %c0_27 = arith.constant 0 : index
      %34 = vector.load %arg9[%c0_26, %c0_27] : memref<16x128xf32, #tpu.memory_space<vmem>>, vector<16x128xf32>
      tpu.vector_store %arg9[%c0_26, %c0_27], %33 {strides = array<i32>} : memref<16x128xf32, #tpu.memory_space<vmem>>, vector<16x128xf32>,
    } else {
    }
    %10 = arith.index_cast %1 : i32 to index
    %c0 = arith.constant 0 : index
    %11 = vector.load %arg8[%10, %c0] : memref<16x128xf32, #tpu.memory_space<vmem>>, vector<16x128xf32>
    %c0_4 = arith.constant 0 : index
    %c0_5 = arith.constant 0 : index
    %12 = vector.load %arg3[%c0_4, %c0_5] : memref<16x16xf32, #tpu.memory_space<vmem>>, vector<16x16xf32>
    %c0_6 = arith.constant 0 : index
    %c0_7 = arith.constant 0 : index
    %13 = vector.load %arg9[%c0_6, %c0_7] : memref<16x128xf32, #tpu.memory_space<vmem>>, vector<16x128xf32>
    %cst = arith.constant dense<0.000000e+00> : vector<16x128xf32>
    %14 = tpu.matmul %12, %13, %cst {dimension_numbers = #tpu.dot_dimension_numbers<[1], [0], [0], [1], [0, 0, 1, 1], [], []>} : vector<16x16xf32>, vector<16x128xf32>, vector<16x128xf32> -> vector<16x128xf32>
    %c0_8 = arith.constant 0 : index
    %c0_9 = arith.constant 0 : index
    %c0_10 = arith.constant 0 : index
    %15 = vector.load %arg5[%c0_8, %c0_9, %c0_10] : memref<1x128x128xf32, #tpu.memory_space<vmem>>, vector<1x128x128xf32>
    %16 = vector.shape_cast %15 : vector<1x128x128xf32> to vector<128x128xf32>
    %cst_11 = arith.constant dense<0.000000e+00> : vector<16x128xf32>
    %17 = tpu.matmul %11, %16, %cst_11 {dimension_numbers = #tpu.dot_dimension_numbers<[1], [0], [0], [1], [0, 0, 1, 1], [], []>} : vector<16x128xf32>, vector<128x128xf32>, vector<16x128xf32> -> vector<16x128xf32>
    %18 = arith.addf %14, %17 : vector<16x128xf32>
    %c0_12 = arith.constant 0 : index
    %c0_13 = arith.constant 0 : index
    %c0_14 = arith.constant 0 : index
    %19 = vector.load %arg6[%c0_12, %c0_13, %c0_14] : memref<1x1x128xf32, #tpu.memory_space<vmem>>, vector<1x1x128xf32>
    %20 = vector.shape_cast %19 : vector<1x1x128xf32> to vector<1x128xf32>
    %21 = vector.broadcast %20 : vector<1x128xf32> to vector<16x128xf32>
    %22 = arith.addf %18, %21 : vector<16x128xf32>
    %cst_15 = arith.constant 0.000000e+00 : f32
    %23 = vector.broadcast %cst_15 : f32 to vector<16x128xf32>
    %24 = arith.maximumf %22, %23 : vector<16x128xf32>
    %25 = arith.index_cast %1 : i32 to index
    %c0_16 = arith.constant 0 : index
    %26 = vector.load %arg8[%25, %c0_16] : memref<16x128xf32, #tpu.memory_space<vmem>>, vector<16x128xf32>
    tpu.vector_store %arg8[%25, %c0_16], %24 {strides = array<i32>} : memref<16x128xf32, #tpu.memory_space<vmem>>, vector<16x128xf32>,
    %c0_17 = arith.constant 0 : index
    %c0_18 = arith.constant 0 : index
    %c0_19 = arith.constant 0 : index
    %27 = vector.load %arg7[%c0_17, %c0_18, %c0_19] : memref<1x16x128xf32, #tpu.memory_space<vmem>>, vector<1x16x128xf32>
    %28 = vector.shape_cast %27 : vector<1x16x128xf32> to vector<16x128xf32>
    %29 = vector.shape_cast %24 : vector<16x128xf32> to vector<1x16x128xf32>
    tpu.vector_store %arg7[%c0_17, %c0_18, %c0_19], %29 {strides = array<i32>} : memref<1x16x128xf32, #tpu.memory_space<vmem>>, vector<1x16x128xf32>,
    return
  }
  func.func @transform_0(%arg0: i32, %arg1: i32) -> (i32, i32) {
    %c0_i32 = arith.constant 0 : i32
    %c0_i32_0 = arith.constant 0 : i32
    %c0_i32_1 = arith.constant 0 : i32
    return %c0_i32, %c0_i32_0 : i32, i32
  }
  func.func @transform_1(%arg0: i32, %arg1: i32) -> (i32, i32) {
    %c0_i32 = arith.constant 0 : i32
    %c0_i32_0 = arith.constant 0 : i32
    return %arg1, %c0_i32 : i32, i32
  }
  func.func @transform_2(%arg0: i32, %arg1: i32) -> (i32, i32, i32) {
    %c0_i32 = arith.constant 0 : i32
    %c0_i32_0 = arith.constant 0 : i32
    %c0_i32_1 = arith.constant 0 : i32
    return %arg0, %c0_i32, %c0_i32_0 : i32, i32, i32
  }
  func.func @transform_3(%arg0: i32, %arg1: i32) -> (i32, i32, i32) {
    %c0_i32 = arith.constant 0 : i32
    %c0_i32_0 = arith.constant 0 : i32
    %c0_i32_1 = arith.constant 0 : i32
    return %arg0, %c0_i32, %c0_i32_0 : i32, i32, i32
  }
  func.func @transform_4(%arg0: i32, %arg1: i32) -> (i32, i32, i32) {
    %c0_i32 = arith.constant 0 : i32
    %c0_i32_0 = arith.constant 0 : i32
    %c0_i32_1 = arith.constant 0 : i32
    return %arg0, %c0_i32, %c0_i32_0 : i32, i32, i32
  }
  func.func @transform_5(%arg0: i32, %arg1: i32) -> (i32, i32, i32) {
    %c0_i32 = arith.constant 0 : i32
    %c0_i32_0 = arith.constant 0 : i32
    return %arg0, %arg1, %c0_i32 : i32, i32, i32
  }
}

</mosaic_0001>

<bundles_post_ra>
// kernel: tpu_custom_call.1
= control target key start
LH: loop header
LB: loop body
LE: loop exit
PB: predicated region body
PF: predicated region fallthrough
CT: control target
= control target key end

     0   :  { %s1281_s0 = inlined_call_operand.hbm [shape: f32[16,128], index: 0, kind: input, shape index: {}]   ;;  %s1282_s1 = inlined_call_operand.hbm [shape: f32[16,16], index: 1, kind: input, shape index: {}]   ;;  %s1283_s2 = inlined_call_operand.hbm [shape: f32[2,128,128], index: 2, kind: input, shape index: {}]   ;;  %s1284_s3 = inlined_call_operand.hbm [shape: f32[2,128,128], index: 3, kind: input, shape index: {}]   ;;  %s1285_s4 = inlined_call_operand.vmem [shape: f32[2,1,128], index: 4, kind: input, shape index: {}]   ;;  %s1286_s5 = inlined_call_operand.hbm [shape: f32[2,16,128], index: 5, kind: output, shape index: {}]  }
   0x1   :  { %1294 = sst [smem:[#allocation20_spill]] %s1281_s0 }
   0x2   :  { %1295 = sst [smem:[#allocation21_spill]] %s1282_s1 }
   0x3   :  { %1296 = sst [smem:[#allocation22_spill]] %s1283_s2 }
   0x4   :  { %10 = vsyncpa [#allocation5], 0 }
   0x5   :  { %11 = vsyncpa [#allocation8], 0 }
   0x6   :  { %12 = vsyncpa [#allocation6], 0 }
   0x7   :  { %14 = vsyncpa [#allocation6 + $0x1], 0  ;;  %s1039_s18 = smov 0   ;;  %s1041_s19 = smov 0  }
   0x8   :  { %s1043_s20 = smov 0   ;;  %s1045_s21 = smov 0  }
   0x9   :  { %s1047_s22 = smov 0   ;;  %s1049_s23 = smov 0  }
   0xa LB: > { %1297 = sst [smem:[#allocation16_spill]] %s997_s22  ;;  %s1070_s24 = sadd.s32 4294967295, %s1001_s23   ;;  %s1001_s23 = sphi %s1049_s23, %s20_s23   ;;  %s997_s22 = sphi %s1047_s22, %s1316_s22   ;;  %s993_s21 = sphi %s1045_s21, %s1315_s21   ;;  %s989_s20 = sphi %s1043_s20, %s1319_s20   ;;  %s985_s19 = sphi %s1041_s19, %s1318_s19   ;;  %s981_s18 = sphi %s1039_s18, %s1317_s18  }
   0xb   : > { %s653_s25 = sadd.s32 4294967294, %s1001_s23   ;;  %p99_p0 = scmp.ne.s32.totalorder %s985_s19, %s981_s18 }
   0xc   : > { %p100_p1 = scmp.eq.s32.totalorder %s1070_s24, 0  ;;  %p177_p2 = scmp.eq.s32.totalorder %s1070_s24, 1 }
   0xd   : > { %p183_p3 = scmp.eq.s32.totalorder %s653_s25, 1  ;;  %p654_p5 = scmp.ge.s32.totalorder %s1001_s23, 1 }
   0xe   : > { %p1079_p4 = por %p100_p1, %p99_p0  ;;  %p190_p7 = scmp.lt.s32.totalorder %s1001_s23, 3 }
   0xf   : > { %p1084_p6 = por %p183_p3, %p99_p0  ;;  %s1301_s0 = sld [smem:[#allocation20_spill]] }
  0x10   : > { %p1092_p8 = pnand %p654_p5, %p190_p7  ;;  %s1003_s7 = smov [#allocation4]  }
  0x11   : > { %s1299_s27 = scalar_select %p1084_p6, 1, 0 }
  0x12   : > { %p712_p9 = pneg %p1092_p8  ;;  %s203_s8 = sshll.u32 %s1003_s7, 4  ;;  %s204_s8 = int_to_ptr.vmem [resolvable:$true] %s203_s8 }
  0x13   : > { %1300 = sst [smem:[#allocation17_spill]] %s1299_s27  ;;  %p657_p11 = scmp.ge.s32.totalorder %s1001_s23, 2 }
  0x14   : > { %p1100_p10 = pnand %p712_p9, %p100_p1  ;;  %s1287_s10 = smov 128  }
  0x15   : > { %s201_s30 = sshll.u32 %s1301_s0, 4  ;;  %s1289_s11 = smov 8   ;;  %s202_s30 = int_to_ptr.hbm [resolvable:$true] %s201_s30 }
  0x16   : > { %715 = dma.hbm_to_vmem [thread:$0]  (!%p1100_p10), %s202_s30, 256, %s204_s8, [#allocation5], %s1287_s10, %s1287_s10, %s1289_s11  }
  0x17   : > { %s32_s12 = sadd.s32 1, %s997_s22  ;;  %s86_s13 = sadd.s32 1, %s989_s20 }
  0x18   : > { %p34_p12 = scmp.ge.s32.totalorder %s32_s12, 2  ;;  %p93_p13 = scmp.ne.s32.totalorder %s989_s20, %s985_s19 }
  0x19   : > { %p94_p0 = scmp.eq.s32.totalorder %s1001_s23, 0  ;;  %p732_p7 = scmp.lt.s32.totalorder %s1001_s23, 2 }
  0x1a   : > { %s1321_s12 = smov (%p34_p12, %s32_s12), 0  ;;  %p1123_p5 = por %p177_p2, %p93_p13 }
  0x1b   : > { %1304 = sst [smem:[#allocation18_spill]] %s1321_s12  ;;  %p1117_p3 = por %p94_p0, %p93_p13 }
  0x1c   : > { %s83_s16 = ssub.s32 %s997_s22, %s1321_s12  ;;  %s234_s17 = sand.u32 1, %s1001_s23  }
  0x1d   : > { %p84_p9 = scmp.eq.s32.totalorder %s83_s16, 0  ;;  %s236_s25 = sand.u32 1, %s989_s20  }
  0x1e   : > { %s658_s29 = sshll.u32 %s236_s25, 7  ;;  %s678_s30 = sshll.u32 %s997_s22, 7 }
  0x1f   : > { %s1133_s28 = scalar_select %p84_p9, %s989_s20, %s86_s13  }
  0x20   : > { %s1308_s2 = sld [smem:[#allocation22_spill]]  ;;  %s238_s0 = scalar_lea.vmem [#allocation9], %s658_s29 }
  0x21   : > { %1307 = sst [smem:[#allocation19_spill]] %s1133_s28  ;;  %s246_s27 = sshll.u32 %s238_s0, 4  ;;  %s247_s27 = int_to_ptr.vmem [resolvable:$true] %s246_s27 }
  0x22   : > { %p1143_p2 = pnand %p732_p7, %p1117_p3  ;;  %s1310_s1 = sld [smem:[#allocation21_spill]] }
  0x23   : > { %s1006_s7 = smov [#allocation7]   ;;  %s1311_s0 = smov 8  }
  0x24   : > { %s220_s8 = sshll.u32 %s1006_s7, 4  ;;  %s265_s13 = scalar_lea.hbm %s1284_s3, %s678_s30  ;;  %s221_s8 = int_to_ptr.vmem [resolvable:$true] %s220_s8 }
  0x25   : > { %s266_s28 = sshll.u32 %s265_s13, 4  ;;  %s267_s28 = int_to_ptr.hbm [resolvable:$true] %s266_s28 }
  0x26   : > { %s243_s10 = scalar_lea.hbm %s1308_s2, %s678_s30  ;;  %s1312_s2 = smov 128  }
  0x27   : > { %s244_s11 = sshll.u32 %s243_s10, 4  ;;  %s235_s10 = scalar_lea.sflag [#allocation5], %s234_s17  ;;  %s245_s11 = int_to_ptr.hbm [resolvable:$true] %s244_s11 }
  0x28   : > { %s218_s25 = sshll.u32 %s1310_s1, 4  ;;  %s260_s1 = scalar_lea.vmem [#allocation10], %s658_s29  ;;  %s219_s25 = int_to_ptr.hbm [resolvable:$true] %s218_s25 }
  0x29   : > { %722 = dma.hbm_to_vmem [thread:$0]  (!%p1143_p2), %s245_s11, 2048, %s247_s27, %s235_s10, %s1312_s2, %s1312_s2, %s1311_s0  }
  0x2a   : > { %718 = dma.hbm_to_vmem [thread:$0]  (!%p1100_p10), %s219_s25, 256, %s221_s8, [#allocation8], %s1312_s2, %s1312_s2, %s1311_s0  }
  0x2b   : > { %s268_s22 = sshll.u32 %s260_s1, 4  ;;  %286 = sbr.rel (%p1092_p8) target bundleno = 381 (0x17d), region = 40  ;;  %s269_s22 = int_to_ptr.vmem [resolvable:$true] %s268_s22 }
  0x2c   : > { %725 = dma.hbm_to_vmem [thread:$0]  (!%p1143_p2), %s267_s28, 2048, %s269_s22, %s235_s10, %s1312_s2, %s1312_s2, %s1311_s0  }
  0x30   : > { %964 = dma.done.wait (%p100_p1), [#allocation5], 256  }
  0x31   : > { %966 = vsyncadd (%p100_p1), [#allocation5], 4294967040 }
  0x32   : > { %968 = dma.done.wait (%p100_p1), [#allocation8], 256  }
  0x33   : > { %970 = vsyncadd (%p100_p1), [#allocation8], 4294967040  ;;  %s298_s1 = sand.u32 1, %s1070_s24   ;;  %s1180_s2 = sand.u32 1, %s985_s19  }
  0x34   : > { %s667_s22 = sshll.u32 %s1180_s2, 7  ;;  %s299_s27 = scalar_lea.sflag [#allocation5], %s298_s1 }
  0x35   : > { %s1183_s6 = scalar_lea.vmem [#allocation9], %s667_s22 }
  0x36   : > { %972 = dma.done.wait (%p1079_p4), %s299_s27, 4096  }
  0x37   : > { %974 = vsyncadd (%p1079_p4), %s299_s27, 4294963200  ;;  %s669_s9 = sshll.u32 %s1180_s2, 4  ;;  %p349_p1 = scmp.lt.s32.totalorder %s993_s21, 1 }
  0x38   : > { %p354_p8 = scmp.eq.s32.totalorder %s993_s21, 0  ;;  %s1199_s29 = scalar_lea.vmem [#allocation10], %s667_s22 }
  0x39   : > { %s1193_s24 = scalar_select %p349_p1, %s993_s21, 1  ;;  %v360_v0 = vld [vmem:[#allocation4] sm:$0xff] (%p354_p8)  ;;  %v361_v1 = vld [vmem:[#allocation4 + $0x8] sm:$0xff] (%p354_p8) }
  0x3a   : > { %s1201_s30 = scalar_lea.vmem [#allocation11], %s669_s9  ;;  %359 = sbr.rel (!%p354_p8) target bundleno = 63 (0x3f), region = 60  ;;  %362 = vst [vmem:[#allocation2] sm:$0xff] (%p354_p8), %v360_v0 }
  0x3b   : > { %s351_s28 = scalar_lea.vmem %s1285_s4, %s1193_s24  ;;  %363 = vst [vmem:[#allocation2 + $0x8] sm:$0xff] (%p354_p8), %v361_v1 }
  0x3f PF: > { %v384_v2 = vld [vmem:[%s1183_s6 + $0x78] sm:$0xff]  ;;  %v383_v3 = vld [vmem:[%s1183_s6 + $0x70] sm:$0xff]  ;;  %v382_v4 = vld [vmem:[%s1183_s6 + $0x68] sm:$0xff]  ;;  %vm456_vm0 = vcmask 130048   ;;  %s681_s25 = sshll.u32 %s993_s21, 4  ;;  %s513_s0 = sshll.u32 %s1201_s30, 4  ;;  %s514_s0 = int_to_ptr.vmem [resolvable:$true] %s513_s0 }
  0x40   : > { %682 = vmatpush.msra.mxu3 %v384_v2  ;;  %385 = vmatpush.msra.mxu0 %v384_v2  ;;  %v381_v5 = vld [vmem:[%s1183_s6 + $0x60] sm:$0xff]  ;;  %v380_v6 = vld [vmem:[%s1183_s6 + $0x58] sm:$0xff]  ;;  %v431_v8 = vld [vmem:[%s1199_s29 + $0x70] sm:$0xff]  ;;  %s512_s10 = scalar_lea.hbm %s1286_s5, %s681_s25  ;;  %s499_s21 = scalar_lea.sflag [#allocation6], %s1180_s2 }
  0x41   : > { %v432_v7 = vld [vmem:[%s1199_s29 + $0x78] sm:$0xff]  ;;  %v379_v9 = vld [vmem:[%s1183_s6 + $0x50] sm:$0xff]  ;;  %v430_v10 = vld [vmem:[%s1199_s29 + $0x68] sm:$0xff]  ;;  %s515_s14 = sshll.u32 %s512_s10, 4  ;;  %s931_s27 = scalar_lea.hbm %s1286_s5, 32  ;;  %s516_s14 = int_to_ptr.hbm [resolvable:$true] %s515_s14 }
  0x42   : > { %683 = vmatpush.msra.mxu3 %v383_v3  ;;  %386 = vmatpush.msra.mxu0 %v383_v3  ;;  %v378_v11 = vld [vmem:[%s1183_s6 + $0x48] sm:$0xff]  ;;  %v429_v12 = vld [vmem:[%s1199_s29 + $0x60] sm:$0xff]  ;;  %v428_v14 = vld [vmem:[%s1199_s29 + $0x58] sm:$0xff]  ;;  %s925_s12 = sshra.s32 %s516_s14, 4  ;;  %s926_s12 = int_to_ptr.hbm [resolvable:$true] %s925_s12 }
  0x43   : > { %433 = vmatpush.msra.mxu1 %v432_v7  ;;  %v377_v13 = vld [vmem:[%s1183_s6 + $0x40] sm:$0xff]  ;;  %v376_v15 = vld [vmem:[%s1183_s6 + $0x38] sm:$0xff]  ;;  %v427_v16 = vld [vmem:[%s1199_s29 + $0x50] sm:$0xff]  ;;  %s927_s13 = scalar_lea.hbm %s926_s12, 16  ;;  %p932_p13 = scmp.lt.s32.totalorder %s926_s12, %s1286_s5 }
  0x44   : > { %684 = vmatpush.msra.mxu3 %v382_v4  ;;  %387 = vmatpush.msra.mxu0 %v382_v4  ;;  %v375_v17 = vld [vmem:[%s1183_s6 + $0x30] sm:$0xff]  ;;  %v426_v18 = vld [vmem:[%s1199_s29 + $0x48] sm:$0xff]  ;;  %v425_v20 = vld [vmem:[%s1199_s29 + $0x40] sm:$0xff]  ;;  %p928_p4 = scmp.ne.s32.totalorder %s926_s12, %s927_s13  ;;  %p933_p0 = scmp.lt.s32.totalorder %s931_s27, %s927_s13 }
  0x45   : > { %434 = vmatpush.msra.mxu1 %v431_v8  ;;  %v374_v19 = vld [vmem:[%s1183_s6 + $0x28] sm:$0xff]  ;;  %v373_v21 = vld [vmem:[%s1183_s6 + $0x20] sm:$0xff]  ;;  %v424_v22 = vld [vmem:[%s1199_s29 + $0x38] sm:$0xff] }
  0x46   : > { %685 = vmatpush.msra.mxu3 %v381_v5  ;;  %388 = vmatpush.msra.mxu0 %v381_v5  ;;  %v372_v23 = vld [vmem:[%s1183_s6 + $0x18] sm:$0xff]  ;;  %v423_v24 = vld [vmem:[%s1199_s29 + $0x30] sm:$0xff]  ;;  %v422_v26 = vld [vmem:[%s1199_s29 + $0x28] sm:$0xff]  ;;  %p929_p10 = pnand %p928_p4, %p1123_p5  ;;  %p934_p3 = por %p933_p0, %p932_p13 }
  0x47   : > { %435 = vmatpush.msra.mxu1 %v430_v10  ;;  %v371_v25 = vld [vmem:[%s1183_s6 + $0x10] sm:$0xff]  ;;  %v370_v27 = vld [vmem:[%s1183_s6 + $0x8] sm:$0xff]  ;;  %v369_v28 = vld [vmem:[%s1183_s6] sm:$0xff] }
  0x48   : > { %686 = vmatpush.msra.mxu3 %v380_v6  ;;  %389 = vmatpush.msra.mxu0 %v380_v6  ;;  %v368_v29 = vld [vmem:[#allocation2 + $0x8] sm:$0xff]  ;;  %v367_v30 = vld [vmem:[#allocation2] sm:$0xff]  ;;  %v421_v31 = vld [vmem:[%s1199_s29 + $0x20] sm:$0xff]  ;;  %p930_p12 = pneg %p929_p10 }
  0x49   : > { %436 = vmatpush.msra.mxu1 %v429_v12  ;;  %v420_v32 = vld [vmem:[%s1199_s29 + $0x18] sm:$0xff]  ;;  %v419_v33 = vld [vmem:[%s1199_s29 + $0x10] sm:$0xff]  ;;  %v418_v34 = vld [vmem:[%s1199_s29 + $0x8] sm:$0xff] }
  0x4a   : > { %687 = vmatpush.msra.mxu3 %v379_v9  ;;  %390 = vmatpush.msra.mxu0 %v379_v9  ;;  %v417_v35 = vld [vmem:[%s1199_s29] sm:$0xff]  ;;  %v413_v38 = vld [vmem:[#allocation7] sm:$0xff]  ;;  %v414_v39 = vld [vmem:[#allocation7 + $0x8] sm:$0xff]  ;;  %p935_p7 = pnand %p934_p3, %p930_p12 }
  0x4b   : > { %437 = vmatpush.msra.mxu1 %v428_v14  ;;  %v790_v41 = vld [vmem:[%s351_s28] ss:$0 sm:$0xff] }
  0x4c   : > { %688 = vmatpush.msra.mxu3 %v378_v11  ;;  %391 = vmatpush.msra.mxu0 %v378_v11 }
  0x4d   : > { %438 = vmatpush.msra.mxu1 %v427_v16 }
  0x4e   : > { %689 = vmatpush.msra.mxu3 %v377_v13  ;;  %392 = vmatpush.msra.mxu0 %v377_v13 }
  0x4f   : > { %439 = vmatpush.msra.mxu1 %v426_v18 }
  0x50   : > { %690 = vmatpush.msra.mxu3 %v376_v15  ;;  %393 = vmatpush.msra.mxu0 %v376_v15 }
  0x51   : > { %440 = vmatpush.msra.mxu1 %v425_v20 }
  0x52   : > { %691 = vmatpush.msra.mxu3 %v375_v17  ;;  %394 = vmatpush.msra.mxu0 %v375_v17 }
  0x53   : > { %441 = vmatpush.msra.mxu1 %v424_v22 }
  0x54   : > { %692 = vmatpush.msra.mxu3 %v374_v19  ;;  %395 = vmatpush.msra.mxu0 %v374_v19 }
  0x55   : > { %442 = vmatpush.msra.mxu1 %v423_v24 }
  0x56   : > { %693 = vmatpush.msra.mxu3 %v373_v21  ;;  %396 = vmatpush.msra.mxu0 %v373_v21 }
  0x57   : > { %443 = vmatpush.msra.mxu1 %v422_v26 }
  0x58   : > { %694 = vmatpush.msra.mxu3 %v372_v23  ;;  %397 = vmatpush.msra.mxu0 %v372_v23 }
  0x59   : > { %444 = vmatpush.msra.mxu1 %v421_v31 }
  0x5a   : > { %695 = vmatpush.msra.mxu3 %v371_v25  ;;  %398 = vmatpush.msra.mxu0 %v371_v25 }
  0x5b   : > { %445 = vmatpush.msra.mxu1 %v420_v32 }
  0x5c   : > { %696 = vmatpush.msra.mxu3 %v370_v27  ;;  %399 = vmatpush.msra.mxu0 %v370_v27 }
  0x5d   : > { %446 = vmatpush.msra.mxu1 %v419_v33 }
  0x5e   : > { %697 = vmatpush.msra.mxu3 %v369_v28  ;;  %400 = vmatpush.msra.mxu0 %v369_v28 }
  0x5f   : > { %404 = vmatmul.f32.vlgmr.msra.gmra.mxu3 %v368_v29  ;;  %401 = vmatmul.f32.vlgmr.msra.gmra.mxu0 %v367_v30 }
  0x60   : > { %447 = vmatpush.msra.mxu1 %v418_v34 }
  0x62   : > { %448 = vmatpush.msra.mxu1 %v417_v35 }
  0x63   : > { %449 = vmatmul.f32.vlgmr.msra.gmra.mxu1 %v367_v30 }
  0x6b   : > { %452 = vmatmul.f32.gmra.mxu1 %v368_v29 }
  0xdc   : > { %v402_v37 = vpop.f32.mrf.mxu0 }
  0xe0   : > { %v450_v40 = vpop.f32.mrf.mxu1 }
  0xe2   : > { %v405_v36 = vpop.f32.mrf.mxu3 }
  0xe3   : > { %477 = vmatpush.msra.mxu2 %v405_v36 }
  0xe5   : > { %478 = vmatpush.msra.mxu2 %v402_v37 }
  0xe6   : > { %671 = vmatmul.msk.f32.vlgmr.msra.gmra.mxu2 %vm456_vm0, %v413_v38 }
  0xe8   : > { %v453_v46 = vpop.f32.mrf.mxu1 }
  0xee   : > { %672 = vmatmul.msk.f32.gmra.mxu2 %vm456_vm0, %v414_v39 }
 0x169   : > { %v480_v42 = vpop.f32.mrf.mxu2 }
 0x16a   : > { %v481_v43 = vadd.f32 %v480_v42, %v450_v40 }
 0x16c   : > { %v490_v44 = vadd.f32 %v790_v41, %v481_v43 }
 0x16e   : > { %v492_v45 = vmax.f32 %v490_v44, 0.0 }
 0x170   : > { %494 = vst [vmem:[#allocation2] sm:$0xff] %v492_v45 }
 0x171   : > { %496 = vst [vmem:[%s1201_s30] sm:$0xff] %v492_v45  ;;  %v483_v47 = vpop.f32.mrf.mxu2 }
 0x172   : > { %v484_v48 = vadd.f32 %v483_v47, %v453_v46 }
 0x174   : > { %v491_v49 = vadd.f32 %v790_v41, %v484_v48 }
 0x176   : > { %v493_v50 = vmax.f32 %v491_v49, 0.0 }
 0x178   : > { %495 = vst [vmem:[#allocation2 + $0x8] sm:$0xff] %v493_v50 }
 0x179   : > { %497 = vst [vmem:[%s1201_s30 + $0x8] sm:$0xff] %v493_v50 }
 0x17a   : > { %938 = shalt.err (!%p935_p7)
}
 0x17b   : > { %s1007_s2 = smov 128   ;;  %s1008_s24 = smov 8  }
 0x17c   : > { %710 = dma.vmem_to_hbm [thread:$0]  (%p1123_p5), %s514_s0, 256, %s516_s14, %s499_s21, %s1007_s2, %s1007_s2, %s1008_s24  }
 0x17d PF: > { %s530_s17 = sand.u32 1, %s981_s18   ;;  %p727_p9 = pnand %p657_p11, %p1084_p6 }
 0x17e   : > { %s531_s28 = scalar_lea.sflag [#allocation6], %s530_s17 }
 0x17f   : > { %p728_p2 = pneg %p727_p9 }
 0x181   : > { %976 = dma.done.wait (%p728_p2), %s531_s28, 256  }
 0x182   : > { %978 = vsyncadd (%p728_p2), %s531_s28, 4294967040  ;;  %s20_s23 = sadd.s32 1, %s1001_s23   ;;  %s1314_s29 = sld [smem:[#allocation19_spill]] }
 0x183   : > { %p17_p1 = scmp.ge.s32.totalorder %s20_s23, 4   ;;  %s1315_s21 = sld [smem:[#allocation16_spill]] }
 0x184   : > { %s1316_s22 = sld [smem:[#allocation18_spill]]  ;;  %s1317_s18 = smov %s985_s19 }
 0x185   : > { %s1318_s19 = smov %s989_s20  ;;  %19 = sbr.rel (!%p17_p1) target bundleno = 10 (0xa), region = 116 }
 0x188   : > { %s1319_s20 = smov %s1314_s29 }
 0x18a   :  { %537 = vsyncpa [#allocation5], 1 }
 0x18b   :  { %539 = vsyncpa [#allocation5 + $0x1], 1 }
 0x18c   :  { %540 = vsyncpa [#allocation8], 1 }
 0x18d   :  { %541 = vsyncpa [#allocation6], 1 }
 0x18e   :  { %543 = vsyncpa [#allocation6 + $0x1], 1 }

</bundles_post_ra>
